<compile_context>
chip_gen: v7x
topology: tpu7x:2x2x1
jax: 0.10.0
libtpu: 0.0.40
codegen_flags: <defaults>
</compile_context>

<pallas_src>
import functools
import math

import jax
import jax.numpy as jnp
from jax.experimental import pallas as pl
from jax.experimental.pallas import tpu as pltpu

LANE = 128
_RESIDENT_WEIGHT_BUDGET = 8 * 2**20   # keep full weight stack VMEM-resident if <= this
_VMEM_CAP = 48 * 2**20                # safe on v5e/v6e (128 MiB) and v7x (64 MiB / TC)


def _round_up(x, m):
    return (x + m - 1) // m * m


def _pick_rows_tile(n_rows, block_rows):
    """Row tile + padded row count; >= 2 row tiles for larger problems so the
    'parallel' axis can shard across v7x's two TensorCores."""
    rp = _round_up(max(n_rows, 8), 8)
    if rp <= block_rows:
        return rp, rp
    n_tiles = max(2, -(-rp // block_rows))
    tm = _round_up(-(-rp // n_tiles), 8)
    return tm, _round_up(rp, tm)


# ----------------------------------------------------------------------------
# Shared in-kernel attention math (token 0 over [row, neg proto, pos proto])
# ----------------------------------------------------------------------------
def _attend_token0(xc, pk, wqkv, *, dp, scale):
    """xc: (tm, dp) compute-dtype rows; pk: (8, dp) f32 slab with rows 0-1 = proto K,
    rows 2-3 = proto V.  Returns the f32 (tm, dp) attention output of token 0."""
    qkv = jnp.dot(xc, wqkv, preferred_element_type=jnp.float32)   # one MXU pass, N=3dp
    q0 = qkv[:, :dp]
    k0 = qkv[:, dp:2 * dp]
    v0 = qkv[:, 2 * dp:]
    # scale applied to the (tm, 1) scores instead of the (tm, dp) queries
    s0 = jnp.sum(q0 * k0, axis=-1, keepdims=True) * scale
    s1 = jnp.sum(q0 * pk[0:1, :], axis=-1, keepdims=True) * scale
    s2 = jnp.sum(q0 * pk[1:2, :], axis=-1, keepdims=True) * scale
    m = jnp.maximum(jnp.maximum(s0, s1), s2)
    e0 = jnp.exp(s0 - m)
    e1 = jnp.exp(s1 - m)
    e2 = jnp.exp(s2 - m)
    den = e0 + e1 + e2
    inv = pl.reciprocal(den, approx=True)      # EUP slot
    inv = inv * (2.0 - den * inv)              # one Newton step -> full f32 accuracy
    return (e0 * inv) * v0 + (e1 * inv) * pk[2:3, :] + (e2 * inv) * pk[3:4, :]


# ----------------------------------------------------------------------------
# Kernel 1: fully fused attention-context + multi-layer MLP
# ----------------------------------------------------------------------------
def _ctx_mlp_kernel(x_ref, pk_ref, wqkv_ref, w_ref, b_ref, o_ref, act_ref, *,
                    n_layers, dp, hp, scale, slope, compute_dtype, resident):
    l = pl.program_id(1)

    def w_for(idx):
        return w_ref[idx] if resident else w_ref[...]

    def b_for(idx):
        return b_ref[idx] if resident else b_ref[...]

    def finish(y):
        # LeakyReLU only between layers; keep the next layer's input in VMEM.
        @pl.when(l < n_layers - 1)
        def _():
            act_ref[...] = jnp.where(y >= 0.0, y, slope * y)

        # Only the final layer's result ever reaches HBM.
        @pl.when(l == n_layers - 1)
        def _():
            o_ref[...] = y.astype(o_ref.dtype)

    @pl.when(l == 0)
    def _():
        xc = x_ref[...].astype(compute_dtype)                      # (tm, dp)
        wqkv = wqkv_ref[...].astype(compute_dtype)                 # (dp, 3dp)
        a0 = _attend_token0(xc, pk_ref[...], wqkv, dp=dp, scale=scale)
        w0 = w_for(l)                                              # (Kmax, hp)
        # Layer 0 acts on [attn(token0) | original row]; the concat is never
        # materialised -- its weight is applied as two matmuls instead.
        y = jnp.dot(a0.astype(compute_dtype), w0[:dp, :].astype(compute_dtype),
                    preferred_element_type=jnp.float32)
        y = y + jnp.dot(xc, w0[dp:2 * dp, :].astype(compute_dtype),
                        preferred_element_type=jnp.float32)
        finish(y + b_for(l))

    @pl.when(l > 0)
    def _():
        a = act_ref[...]                                           # (tm, hp) f32
        w = w_for(l)[:hp, :].astype(compute_dtype)
        y = jnp.dot(a.astype(compute_dtype), w, preferred_element_type=jnp.float32)
        finish(y + b_for(l))


# ----------------------------------------------------------------------------
# Kernel 2: attention + concat only (num_layers == 0 -> MLP is nn.Identity)
# ----------------------------------------------------------------------------
def _attn_concat_kernel(x_ref, pk_ref, wqkv_ref, o_ref, *, dp, scale, compute_dtype):
    x = x_ref[...]
    a0 = _attend_token0(x.astype(compute_dtype), pk_ref[...],
                        wqkv_ref[...].astype(compute_dtype), dp=dp, scale=scale)
    o_ref[:, :dp] = a0.astype(o_ref.dtype)
    o_ref[:, dp:] = x.astype(o_ref.dtype)


# ----------------------------------------------------------------------------
# Parameter packing
# ----------------------------------------------------------------------------
def _pad2(w, rows, cols):
    r, c = w.shape
    return jnp.pad(w, ((0, rows - r), (0, cols - c)))


def pack_qkv(params, dp, dtype):
    """Fuse wq/wk/wv into one (dp, 3dp) weight (each (d,d) block padded separately)."""
    return jnp.concatenate(
        [_pad2(params["wq"], dp, dp), _pad2(params["wk"], dp, dp),
         _pad2(params["wv"], dp, dp)], axis=1).astype(dtype)


def pack_mlp(mlp_params, d, dp, dtype):
    """Stack MLP layers to (L, Kmax, Hp) (K/N padded separately).  Layer 0's
    (2d, H) weight is split so it can be applied to [attn | orig] directly:
    rows [0:d] act on the attention output, rows [dp:dp+d] act on the original row."""
    L = len(mlp_params)
    hidden = mlp_params[0][0].shape[1]
    hp = _round_up(hidden, LANE)
    kmax = max(2 * dp, hp)
    w_stack = jnp.zeros((L, kmax, hp), dtype)
    b_stack = jnp.zeros((L, 1, hp), jnp.float32)
    w0, b0 = mlp_params[0]
    w_stack = w_stack.at[0, :d, :hidden].set(w0[:d].astype(dtype))
    w_stack = w_stack.at[0, dp:dp + d, :hidden].set(w0[d:].astype(dtype))
    b_stack = b_stack.at[0, 0, :hidden].set(b0)
    for li in range(1, L):
        w, b = mlp_params[li]
        w_stack = w_stack.at[li, :w.shape[0], :w.shape[1]].set(w.astype(dtype))
        b_stack = b_stack.at[li, 0, :w.shape[1]].set(b)
    return w_stack, b_stack, hp, kmax


def proto_kv_slab(protos, params, d, dp):
    """Grid-invariant prototype K/V projections, hoisted out of the kernel."""
    kp = jnp.dot(protos, params["wk"], precision=jax.lax.Precision.HIGHEST)
    vp = jnp.dot(protos, params["wv"], precision=jax.lax.Precision.HIGHEST)
    slab = jnp.zeros((8, dp), jnp.float32)
    return slab.at[0:2, :d].set(kp).at[2:4, :d].set(vp)


# ----------------------------------------------------------------------------
# Wrappers
# ----------------------------------------------------------------------------
def fused_context_mlp(x0, pk, wqkv, w_stack, b_stack, *, d, dp, hp, kmax, out_dim,
                      scale, slope=0.01, block_rows=512, use_bf16=False):
    B = x0.shape[0]
    L = w_stack.shape[0]
    tm, bp = _pick_rows_tile(B, block_rows)
    store_dtype = jnp.bfloat16 if use_bf16 else jnp.float32
    compute_dtype = jnp.bfloat16 if use_bf16 else jnp.float32
    itemsize = jnp.dtype(store_dtype).itemsize

    xp = jnp.zeros((bp, dp), store_dtype).at[:B, :d].set(x0.astype(store_dtype))

    # Keep the whole weight stack VMEM-resident (single DMA) when it fits;
    # otherwise stream per layer (v7x has only 64 MiB VMEM per TensorCore).
    resident = L * kmax * hp * itemsize <= _RESIDENT_WEIGHT_BUDGET
    if resident:
        w_spec = pl.BlockSpec((L, kmax, hp), lambda i, l: (0, 0, 0))
        b_spec = pl.BlockSpec((L, 1, hp), lambda i, l: (0, 0, 0))
    else:
        w_spec = pl.BlockSpec((None, kmax, hp), lambda i, l: (l, 0, 0))
        b_spec = pl.BlockSpec((None, 1, hp), lambda i, l: (l, 0, 0))

    w_copies = L if resident else 1
    need = (2 * tm * dp * itemsize              # x (double-buffered)
            + 2 * 8 * dp * 4                    # proto K/V slab
            + 2 * dp * 3 * dp * itemsize        # fused qkv weight
            + 2 * w_copies * kmax * hp * itemsize
            + 2 * w_copies * hp * 4
            + 2 * tm * hp * 4                   # output
            + tm * hp * 4)                      # activation scratch
    vmem_limit = int(min(max(need + (need >> 2) + (2 << 20), 16 << 20), _VMEM_CAP))

    kernel = functools.partial(
        _ctx_mlp_kernel, n_layers=L, dp=dp, hp=hp, scale=scale, slope=slope,
        compute_dtype=compute_dtype, resident=resident)

    flops = 2 * bp * dp * 3 * dp + 4 * bp * dp * hp + 2 * bp * hp * hp * max(L - 1, 0)
    bytes_accessed = (bp * dp + dp * 3 * dp + L * kmax * hp) * itemsize + bp * hp * 4

    out = pl.pallas_call(
        kernel,
        out_shape=jax.ShapeDtypeStruct((bp, hp), jnp.float32),
        grid=(bp // tm, L),
        in_specs=[
            pl.BlockSpec((tm, dp), lambda i, l: (i, 0)),
            pl.BlockSpec((8, dp), lambda i, l: (0, 0)),
            pl.BlockSpec((dp, 3 * dp), lambda i, l: (0, 0)),
            w_spec,
            b_spec,
        ],
        out_specs=pl.BlockSpec((tm, hp), lambda i, l: (i, 0)),
        scratch_shapes=[pltpu.VMEM((tm, hp), jnp.float32)],
        compiler_params=pltpu.CompilerParams(
            dimension_semantics=("parallel", "arbitrary"),
            vmem_limit_bytes=vmem_limit),
        cost_estimate=pl.CostEstimate(flops=flops, transcendentals=4 * bp,
                                      bytes_accessed=bytes_accessed),
    )(xp, pk, wqkv, w_stack, b_stack)
    return out[:B, :out_dim]


def attention_concat(x0, pk, wqkv, *, d, dp, scale, block_rows=512, use_bf16=False):
    """num_layers == 0 path: returns [attn(token0) | original row]  (B, 2d)."""
    B = x0.shape[0]
    tm, bp = _pick_rows_tile(B, block_rows)
    store_dtype = jnp.bfloat16 if use_bf16 else jnp.float32
    compute_dtype = jnp.bfloat16 if use_bf16 else jnp.float32
    itemsize = jnp.dtype(store_dtype).itemsize
    xp = jnp.zeros((bp, dp), store_dtype).at[:B, :d].set(x0.astype(store_dtype))

    need = 2 * (tm * dp + 8 * dp + dp * 3 * dp) * itemsize + 2 * tm * 2 * dp * 4
    vmem_limit = int(min(max(2 * need, 16 << 20), _VMEM_CAP))

    kernel = functools.partial(_attn_concat_kernel, dp=dp, scale=scale,
                               compute_dtype=compute_dtype)
    out = pl.pallas_call(
        kernel,
        out_shape=jax.ShapeDtypeStruct((bp, 2 * dp), jnp.float32),
        grid=(bp // tm,),
        in_specs=[
            pl.BlockSpec((tm, dp), lambda i: (i, 0)),
            pl.BlockSpec((8, dp), lambda i: (0, 0)),
            pl.BlockSpec((dp, 3 * dp), lambda i: (0, 0)),
        ],
        out_specs=pl.BlockSpec((tm, 2 * dp), lambda i: (i, 0)),
        compiler_params=pltpu.CompilerParams(
            dimension_semantics=("parallel",),
            vmem_limit_bytes=vmem_limit),
    )(xp, pk, wqkv)
    return jnp.concatenate([out[:B, :d], out[:B, dp:dp + d]], axis=-1)


# ----------------------------------------------------------------------------
# Parameter init + full ContextMLP forward
# ----------------------------------------------------------------------------
def init_context_mlp_params(key, inp_dim, hidden_dim, num_layers):
    """nn.Linear-style uniform(+/- 1/sqrt(fan_in)) init; weights stored (in, out)."""
    d = inp_dim
    key, kqkv = jax.random.split(key)
    bound = 1.0 / math.sqrt(d)
    wqkv = jax.random.uniform(kqkv, (d, 3 * d), jnp.float32, -bound, bound)
    params = {"wq": wqkv[:, :d], "wk": wqkv[:, d:2 * d], "wv": wqkv[:, 2 * d:]}

    mlp = []
    in_dim = 2 * inp_dim                      # pre_fc=0: MLP sees concatenated emb
    for _ in range(num_layers):
        key, kw, kb = jax.random.split(key, 3)
        bw = 1.0 / math.sqrt(in_dim)
        w = jax.random.uniform(kw, (in_dim, hidden_dim), jnp.float32, -bw, bw)
        b = jax.random.uniform(kb, (hidden_dim,), jnp.float32, -bw, bw)
        mlp.append((w, b))
        in_dim = hidden_dim
    params["mlp"] = mlp
    return params


def context_mlp_forward(params, s_emb, q_emb, *, block_rows=512, use_bf16=False):
    n_support, d = s_emb.shape
    n_query = q_emb.shape[0]
    n_total = n_support + 1

    # all_emb = cat(repeat(s_emb), q_emb) flattened to rows (one row per token 0).
    s_rep = jnp.broadcast_to(s_emb[None, :, :], (n_query, n_support, d))
    x0 = jnp.concatenate([s_rep, q_emb[:, None, :]],
                         axis=1).reshape(n_query * n_total, d)

    # Prototypes are query-independent (rows [:2*n_shot] are pure s_emb rows).
    n_shot = n_support // 2
    protos = jnp.stack([jnp.mean(s_emb[:n_shot], axis=0),
                        jnp.mean(s_emb[n_shot:2 * n_shot], axis=0)], axis=0)

    dp = _round_up(d, LANE)
    store_dtype = jnp.bfloat16 if use_bf16 else jnp.float32
    wqkv = pack_qkv(params, dp, store_dtype)
    pk = proto_kv_slab(protos, params, d, dp)
    scale = float(d) ** -0.5                  # num_heads = 1 -> head_dim = d

    mlp = params["mlp"]
    if len(mlp) == 0:                         # MLP(num_layers=0) == nn.Identity()
        out = attention_concat(x0, pk, wqkv, d=d, dp=dp, scale=scale,
                               block_rows=block_rows, use_bf16=use_bf16)
        return out.reshape(n_query, n_total, -1), None

    w_stack, b_stack, hp, kmax = pack_mlp(mlp, d, dp, store_dtype)
    out = fused_context_mlp(x0, pk, wqkv, w_stack, b_stack, d=d, dp=dp, hp=hp,
                            kmax=kmax, out_dim=mlp[-1][0].shape[1], scale=scale,
                            block_rows=block_rows, use_bf16=use_bf16)
    return out.reshape(n_query, n_total, -1), None


# ----------------------------------------------------------------------------
# Pure-JAX reference (mirrors the PyTorch module op-for-op)
# ----------------------------------------------------------------------------
def reference_forward(params, s_emb, q_emb):
    n_support, d = s_emb.shape
    n_query = q_emb.shape[0]
    s_rep = jnp.broadcast_to(s_emb[None, :, :], (n_query, n_support, d))
    all_emb = jnp.concatenate([s_rep, q_emb[:, None, :]], axis=1)
    orig = all_emb
    n_shot = n_support // 2
    neg = jnp.repeat(all_emb[:, :n_shot].mean(1)[:, None, :], n_support + 1, axis=1)
    pos = jnp.repeat(all_emb[:, n_shot:2 * n_shot].mean(1)[:, None, :],
                     n_support + 1, axis=1)
    stacked = jnp.stack([all_emb, neg, pos], axis=-2)          # (q, s, 3, d)
    qn, sn, nn, dd = stacked.shape
    x = stacked.reshape(qn * sn, nn, dd)
    q = x @ params["wq"]; k = x @ params["wk"]; v = x @ params["wv"]
    attn = jnp.einsum("bnd,bmd->bnm", q, k) * (dd ** -0.5)
    attn = jax.nn.softmax(attn, axis=-1)
    ax = jnp.einsum("bnm,bmd->bnd", attn, v).reshape(qn, sn, nn, dd)
    out = jnp.concatenate([ax[:, :, 0], orig], axis=-1)
    L = len(params["mlp"])
    for li, (w, b) in enumerate(params["mlp"]):
        out = out @ w + b
        if li < L - 1:
            out = jnp.where(out >= 0, out, 0.01 * out)
    return out


if __name__ == "__main__":
    inp_dim = 128
    hidden_dim = 128
    num_layers = 2
    n_support = 4          # 2-way 2-shot support set
    n_query = 6

    key = jax.random.PRNGKey(0)
    key, ks, kq = jax.random.split(key, 3)
    s_emb = jax.random.normal(ks, (n_support, inp_dim), jnp.float32)
    q_emb = jax.random.normal(kq, (n_query, inp_dim), jnp.float32)
    params = init_context_mlp_params(key, inp_dim, hidden_dim, num_layers)

    fwd = jax.jit(context_mlp_forward)
    out, aux = fwd(params, s_emb, q_emb)
    out = jax.block_until_ready(out)

    assert aux is None
    assert out.shape == (n_query, n_support + 1, hidden_dim)

    with jax.default_matmul_precision("highest"):
        ref = reference_forward(params, s_emb, q_emb)
    max_err = float(jnp.max(jnp.abs(out - ref)))
    assert jnp.allclose(out, ref, atol=1e-3, rtol=1e-3), max_err

    print("KERNEL_OK")
</pallas_src>

<mosaic_0001>
module attributes {stable_mosaic.version = 11 : i64} {
  func.func @_ctx_mlp_kernel(%arg0: i32, %arg1: i32, %arg2: memref<32x128xf32, #tpu.memory_space<vmem>>, %arg3: memref<8x128xf32, #tpu.memory_space<vmem>>, %arg4: memref<128x384xf32, #tpu.memory_space<vmem>>, %arg5: memref<2x256x128xf32, #tpu.memory_space<vmem>>, %arg6: memref<2x1x128xf32, #tpu.memory_space<vmem>>, %arg7: memref<32x128xf32, #tpu.memory_space<vmem>>, %arg8: memref<32x128xf32, #tpu.memory_space<vmem>>) attributes {dimension_semantics = [#tpu.dimension_semantics<parallel>, #tpu.dimension_semantics<arbitrary>], iteration_bounds = array<i64: 1, 2>, scalar_prefetch = 0 : i64, scratch_operands = 1 : i64, tpu.core_type = #tpu.core_type<tc>, window_params = [{transform_indices = @transform_0, window_bounds = array<i64: 32, 128>}, {pipeline_mode = #tpu.pipeline_mode<synchronous>, transform_indices = @transform_1, window_bounds = array<i64: 8, 128>}, {pipeline_mode = #tpu.pipeline_mode<synchronous>, transform_indices = @transform_2, window_bounds = array<i64: 128, 384>}, {pipeline_mode = #tpu.pipeline_mode<synchronous>, transform_indices = @transform_3, window_bounds = array<i64: 2, 256, 128>}, {pipeline_mode = #tpu.pipeline_mode<synchronous>, transform_indices = @transform_4, window_bounds = array<i64: 2, 1, 128>}, {transform_indices = @transform_5, window_bounds = array<i64: 32, 128>}]} {
    %c0_i32 = arith.constant 0 : i32
    %0 = arith.cmpi eq, %arg1, %c0_i32 : i32
    %1 = arith.extui %0 : i1 to i32
    %c0_i32_0 = arith.constant 0 : i32
    %2 = arith.cmpi ne, %1, %c0_i32_0 : i32
    scf.if %2 {
      %c0 = arith.constant 0 : index
      %c0_3 = arith.constant 0 : index
      %6 = vector.load %arg2[%c0, %c0_3] : memref<32x128xf32, #tpu.memory_space<vmem>>, vector<32x128xf32>
      %c0_4 = arith.constant 0 : index
      %c0_5 = arith.constant 0 : index
      %7 = vector.load %arg4[%c0_4, %c0_5] : memref<128x384xf32, #tpu.memory_space<vmem>>, vector<128x384xf32>
      %c0_6 = arith.constant 0 : index
      %c0_7 = arith.constant 0 : index
      %8 = vector.load %arg3[%c0_6, %c0_7] : memref<8x128xf32, #tpu.memory_space<vmem>>, vector<8x128xf32>
      %cst = arith.constant dense<0.000000e+00> : vector<32x384xf32>
      %9 = tpu.matmul %6, %7, %cst {dimension_numbers = #tpu.dot_dimension_numbers<[1], [0], [0], [1], [0, 0, 1, 1], [], []>} : vector<32x128xf32>, vector<128x384xf32>, vector<32x384xf32> -> vector<32x384xf32>
      %10 = vector.extract_strided_slice %9 {offsets = [0, 0], sizes = [32, 128], strides = [1, 1]} : vector<32x384xf32> to vector<32x128xf32>
      %11 = vector.extract_strided_slice %9 {offsets = [0, 128], sizes = [32, 128], strides = [1, 1]} : vector<32x384xf32> to vector<32x128xf32>
      %12 = vector.extract_strided_slice %9 {offsets = [0, 256], sizes = [32, 128], strides = [1, 1]} : vector<32x384xf32> to vector<32x128xf32>
      %13 = arith.mulf %10, %11 : vector<32x128xf32>
      %cst_8 = arith.constant dense<0.000000e+00> : vector<32xf32>
      %14 = vector.multi_reduction <add>, %13, %cst_8 [1] : vector<32x128xf32> to vector<32xf32>
      %15 = vector.shape_cast %14 : vector<32xf32> to vector<32x1xf32>
      %cst_9 = arith.constant 0.0883883461 : f32
      %16 = vector.broadcast %cst_9 : f32 to vector<32x1xf32>
      %17 = arith.mulf %15, %16 : vector<32x1xf32>
      %18 = vector.extract_strided_slice %8 {offsets = [0, 0], sizes = [1, 128], strides = [1, 1]} : vector<8x128xf32> to vector<1x128xf32>
      %19 = vector.broadcast %18 : vector<1x128xf32> to vector<32x128xf32>
      %20 = arith.mulf %10, %19 : vector<32x128xf32>
      %cst_10 = arith.constant dense<0.000000e+00> : vector<32xf32>
      %21 = vector.multi_reduction <add>, %20, %cst_10 [1] : vector<32x128xf32> to vector<32xf32>
      %22 = vector.shape_cast %21 : vector<32xf32> to vector<32x1xf32>
      %cst_11 = arith.constant 0.0883883461 : f32
      %23 = vector.broadcast %cst_11 : f32 to vector<32x1xf32>
      %24 = arith.mulf %22, %23 : vector<32x1xf32>
      %25 = vector.extract_strided_slice %8 {offsets = [1, 0], sizes = [1, 128], strides = [1, 1]} : vector<8x128xf32> to vector<1x128xf32>
      %26 = vector.broadcast %25 : vector<1x128xf32> to vector<32x128xf32>
      %27 = arith.mulf %10, %26 : vector<32x128xf32>
      %cst_12 = arith.constant dense<0.000000e+00> : vector<32xf32>
      %28 = vector.multi_reduction <add>, %27, %cst_12 [1] : vector<32x128xf32> to vector<32xf32>
      %29 = vector.shape_cast %28 : vector<32xf32> to vector<32x1xf32>
      %cst_13 = arith.constant 0.0883883461 : f32
      %30 = vector.broadcast %cst_13 : f32 to vector<32x1xf32>
      %31 = arith.mulf %29, %30 : vector<32x1xf32>
      %32 = arith.maximumf %17, %24 : vector<32x1xf32>
      %33 = arith.maximumf %32, %31 : vector<32x1xf32>
      %34 = arith.subf %17, %33 : vector<32x1xf32>
      %35 = math.exp %34 : vector<32x1xf32>
      %36 = arith.subf %24, %33 : vector<32x1xf32>
      %37 = math.exp %36 : vector<32x1xf32>
      %38 = arith.subf %31, %33 : vector<32x1xf32>
      %39 = math.exp %38 : vector<32x1xf32>
      %40 = arith.addf %35, %37 : vector<32x1xf32>
      %41 = arith.addf %40, %39 : vector<32x1xf32>
      %42 = tpu.reciprocal %41 {approx = true} : vector<32x1xf32> -> vector<32x1xf32>
      %43 = arith.mulf %41, %42 : vector<32x1xf32>
      %cst_14 = arith.constant 2.000000e+00 : f32
      %44 = vector.broadcast %cst_14 : f32 to vector<32x1xf32>
      %45 = arith.subf %44, %43 : vector<32x1xf32>
      %46 = arith.mulf %42, %45 : vector<32x1xf32>
      %47 = arith.mulf %35, %46 : vector<32x1xf32>
      %48 = vector.broadcast %47 : vector<32x1xf32> to vector<32x128xf32>
      %49 = arith.mulf %48, %12 : vector<32x128xf32>
      %50 = arith.mulf %37, %46 : vector<32x1xf32>
      %51 = vector.extract_strided_slice %8 {offsets = [2, 0], sizes = [1, 128], strides = [1, 1]} : vector<8x128xf32> to vector<1x128xf32>
      %52 = vector.broadcast %50 : vector<32x1xf32> to vector<32x128xf32>
      %53 = vector.broadcast %51 : vector<1x128xf32> to vector<32x128xf32>
      %54 = arith.mulf %52, %53 : vector<32x128xf32>
      %55 = arith.addf %49, %54 : vector<32x128xf32>
      %56 = arith.mulf %39, %46 : vector<32x1xf32>
      %57 = vector.extract_strided_slice %8 {offsets = [3, 0], sizes = [1, 128], strides = [1, 1]} : vector<8x128xf32> to vector<1x128xf32>
      %58 = vector.broadcast %56 : vector<32x1xf32> to vector<32x128xf32>
      %59 = vector.broadcast %57 : vector<1x128xf32> to vector<32x128xf32>
      %60 = arith.mulf %58, %59 : vector<32x128xf32>
      %61 = arith.addf %55, %60 : vector<32x128xf32>
      %62 = arith.index_cast %arg1 : i32 to index
      %c0_15 = arith.constant 0 : index
      %c0_16 = arith.constant 0 : index
      %63 = vector.load %arg5[%62, %c0_15, %c0_16] : memref<2x256x128xf32, #tpu.memory_space<vmem>>, vector<1x256x128xf32>
      %64 = vector.shape_cast %63 : vector<1x256x128xf32> to vector<256x128xf32>
      %65 = vector.extract_strided_slice %64 {offsets = [0, 0], sizes = [128, 128], strides = [1, 1]} : vector<256x128xf32> to vector<128x128xf32>
      %cst_17 = arith.constant dense<0.000000e+00> : vector<32x128xf32>
      %66 = tpu.matmul %61, %65, %cst_17 {dimension_numbers = #tpu.dot_dimension_numbers<[1], [0], [0], [1], [0, 0, 1, 1], [], []>} : vector<32x128xf32>, vector<128x128xf32>, vector<32x128xf32> -> vector<32x128xf32>
      %67 = vector.extract_strided_slice %64 {offsets = [128, 0], sizes = [128, 128], strides = [1, 1]} : vector<256x128xf32> to vector<128x128xf32>
      %cst_18 = arith.constant dense<0.000000e+00> : vector<32x128xf32>
      %68 = tpu.matmul %6, %67, %cst_18 {dimension_numbers = #tpu.dot_dimension_numbers<[1], [0], [0], [1], [0, 0, 1, 1], [], []>} : vector<32x128xf32>, vector<128x128xf32>, vector<32x128xf32> -> vector<32x128xf32>
      %69 = arith.addf %66, %68 : vector<32x128xf32>
      %70 = arith.index_cast %arg1 : i32 to index
      %c0_19 = arith.constant 0 : index
      %c0_20 = arith.constant 0 : index
      %71 = vector.load %arg6[%70, %c0_19, %c0_20] : memref<2x1x128xf32, #tpu.memory_space<vmem>>, vector<1x1x128xf32>
      %72 = vector.shape_cast %71 : vector<1x1x128xf32> to vector<1x128xf32>
      %73 = vector.broadcast %72 : vector<1x128xf32> to vector<32x128xf32>
      %74 = arith.addf %69, %73 : vector<32x128xf32>
      %c1_i32 = arith.constant 1 : i32
      %75 = arith.cmpi slt, %arg1, %c1_i32 : i32
      %76 = arith.extui %75 : i1 to i32
      %c0_i32_21 = arith.constant 0 : i32
      %77 = arith.cmpi ne, %76, %c0_i32_21 : i32
      scf.if %77 {
        %cst_24 = arith.constant 0.000000e+00 : f32
        %81 = vector.broadcast %cst_24 : f32 to vector<32x128xf32>
        %82 = arith.cmpf oge, %74, %81 : vector<32x128xf32>
        %cst_25 = arith.constant 0.00999999977 : f32
        %83 = vector.broadcast %cst_25 : f32 to vector<32x128xf32>
        %84 = arith.mulf %83, %74 : vector<32x128xf32>
        %85 = arith.select %82, %74, %84 : vector<32x128xi1>, vector<32x128xf32>
        %c0_26 = arith.constant 0 : index
        %c0_27 = arith.constant 0 : index
        %86 = vector.load %arg8[%c0_26, %c0_27] : memref<32x128xf32, #tpu.memory_space<vmem>>, vector<32x128xf32>
        tpu.vector_store %arg8[%c0_26, %c0_27], %85 {strides = array<i32>} : memref<32x128xf32, #tpu.memory_space<vmem>>, vector<32x128xf32>,
      } else {
      }
      %c1_i32_22 = arith.constant 1 : i32
      %78 = arith.cmpi eq, %arg1, %c1_i32_22 : i32
      %79 = arith.extui %78 : i1 to i32
      %c0_i32_23 = arith.constant 0 : i32
      %80 = arith.cmpi ne, %79, %c0_i32_23 : i32
      scf.if %80 {
        %c0_24 = arith.constant 0 : index
        %c0_25 = arith.constant 0 : index
        %81 = vector.load %arg7[%c0_24, %c0_25] : memref<32x128xf32, #tpu.memory_space<vmem>>, vector<32x128xf32>
        tpu.vector_store %arg7[%c0_24, %c0_25], %74 {strides = array<i32>} : memref<32x128xf32, #tpu.memory_space<vmem>>, vector<32x128xf32>,
      } else {
      }
    } else {
    }
    %c0_i32_1 = arith.constant 0 : i32
    %3 = arith.cmpi sgt, %arg1, %c0_i32_1 : i32
    %4 = arith.extui %3 : i1 to i32
    %c0_i32_2 = arith.constant 0 : i32
    %5 = arith.cmpi ne, %4, %c0_i32_2 : i32
    scf.if %5 {
      %c0 = arith.constant 0 : index
      %c0_3 = arith.constant 0 : index
      %6 = vector.load %arg8[%c0, %c0_3] : memref<32x128xf32, #tpu.memory_space<vmem>>, vector<32x128xf32>
      %7 = arith.index_cast %arg1 : i32 to index
      %c0_4 = arith.constant 0 : index
      %c0_5 = arith.constant 0 : index
      %8 = vector.load %arg5[%7, %c0_4, %c0_5] : memref<2x256x128xf32, #tpu.memory_space<vmem>>, vector<1x256x128xf32>
      %9 = vector.shape_cast %8 : vector<1x256x128xf32> to vector<256x128xf32>
      %10 = vector.extract_strided_slice %9 {offsets = [0, 0], sizes = [128, 128], strides = [1, 1]} : vector<256x128xf32> to vector<128x128xf32>
      %cst = arith.constant dense<0.000000e+00> : vector<32x128xf32>
      %11 = tpu.matmul %6, %10, %cst {dimension_numbers = #tpu.dot_dimension_numbers<[1], [0], [0], [1], [0, 0, 1, 1], [], []>} : vector<32x128xf32>, vector<128x128xf32>, vector<32x128xf32> -> vector<32x128xf32>
      %12 = arith.index_cast %arg1 : i32 to index
      %c0_6 = arith.constant 0 : index
      %c0_7 = arith.constant 0 : index
      %13 = vector.load %arg6[%12, %c0_6, %c0_7] : memref<2x1x128xf32, #tpu.memory_space<vmem>>, vector<1x1x128xf32>
      %14 = vector.shape_cast %13 : vector<1x1x128xf32> to vector<1x128xf32>
      %15 = vector.broadcast %14 : vector<1x128xf32> to vector<32x128xf32>
      %16 = arith.addf %11, %15 : vector<32x128xf32>
      %c1_i32 = arith.constant 1 : i32
      %17 = arith.cmpi slt, %arg1, %c1_i32 : i32
      %18 = arith.extui %17 : i1 to i32
      %c0_i32_8 = arith.constant 0 : i32
      %19 = arith.cmpi ne, %18, %c0_i32_8 : i32
      scf.if %19 {
        %cst_11 = arith.constant 0.000000e+00 : f32
        %23 = vector.broadcast %cst_11 : f32 to vector<32x128xf32>
        %24 = arith.cmpf oge, %16, %23 : vector<32x128xf32>
        %cst_12 = arith.constant 0.00999999977 : f32
        %25 = vector.broadcast %cst_12 : f32 to vector<32x128xf32>
        %26 = arith.mulf %25, %16 : vector<32x128xf32>
        %27 = arith.select %24, %16, %26 : vector<32x128xi1>, vector<32x128xf32>
        %c0_13 = arith.constant 0 : index
        %c0_14 = arith.constant 0 : index
        %28 = vector.load %arg8[%c0_13, %c0_14] : memref<32x128xf32, #tpu.memory_space<vmem>>, vector<32x128xf32>
        tpu.vector_store %arg8[%c0_13, %c0_14], %27 {strides = array<i32>} : memref<32x128xf32, #tpu.memory_space<vmem>>, vector<32x128xf32>,
      } else {
      }
      %c1_i32_9 = arith.constant 1 : i32
      %20 = arith.cmpi eq, %arg1, %c1_i32_9 : i32
      %21 = arith.extui %20 : i1 to i32
      %c0_i32_10 = arith.constant 0 : i32
      %22 = arith.cmpi ne, %21, %c0_i32_10 : i32
      scf.if %22 {
        %c0_11 = arith.constant 0 : index
        %c0_12 = arith.constant 0 : index
        %23 = vector.load %arg7[%c0_11, %c0_12] : memref<32x128xf32, #tpu.memory_space<vmem>>, vector<32x128xf32>
        tpu.vector_store %arg7[%c0_11, %c0_12], %16 {strides = array<i32>} : memref<32x128xf32, #tpu.memory_space<vmem>>, vector<32x128xf32>,
      } else {
      }
    } else {
    }
    return
  }
  func.func @transform_0(%arg0: i32, %arg1: i32) -> (i32, i32) {
    %c0_i32 = arith.constant 0 : i32
    %c0_i32_0 = arith.constant 0 : i32
    return %arg0, %c0_i32 : i32, i32
  }
  func.func @transform_1(%arg0: i32, %arg1: i32) -> (i32, i32) {
    %c0_i32 = arith.constant 0 : i32
    %c0_i32_0 = arith.constant 0 : i32
    %c0_i32_1 = arith.constant 0 : i32
    return %c0_i32, %c0_i32_0 : i32, i32
  }
  func.func @transform_2(%arg0: i32, %arg1: i32) -> (i32, i32) {
    %c0_i32 = arith.constant 0 : i32
    %c0_i32_0 = arith.constant 0 : i32
    %c0_i32_1 = arith.constant 0 : i32
    return %c0_i32, %c0_i32_0 : i32, i32
  }
  func.func @transform_3(%arg0: i32, %arg1: i32) -> (i32, i32, i32) {
    %c0_i32 = arith.constant 0 : i32
    %c0_i32_0 = arith.constant 0 : i32
    %c0_i32_1 = arith.constant 0 : i32
    %c0_i32_2 = arith.constant 0 : i32
    return %c0_i32, %c0_i32_0, %c0_i32_1 : i32, i32, i32
  }
  func.func @transform_4(%arg0: i32, %arg1: i32) -> (i32, i32, i32) {
    %c0_i32 = arith.constant 0 : i32
    %c0_i32_0 = arith.constant 0 : i32
    %c0_i32_1 = arith.constant 0 : i32
    %c0_i32_2 = arith.constant 0 : i32
    return %c0_i32, %c0_i32_0, %c0_i32_1 : i32, i32, i32
  }
  func.func @transform_5(%arg0: i32, %arg1: i32) -> (i32, i32) {
    %c0_i32 = arith.constant 0 : i32
    %c0_i32_0 = arith.constant 0 : i32
    return %arg0, %c0_i32 : i32, i32
  }
}

</mosaic_0001>

<bundles_post_ra>
// kernel: context_mlp_forward.1
= control target key start
LH: loop header
LB: loop body
LE: loop exit
PB: predicated region body
PF: predicated region fallthrough
CT: control target
= control target key end

     0   :  { %s1639_s18 = smov 0   ;;  %s1641_s19 = smov 0   ;;  %s1973_s0 = inlined_call_operand.vmem [shape: f32[32,128], index: 0, kind: input, shape index: {}]   ;;  %s1974_s1 = inlined_call_operand.vmem [shape: f32[8,128], index: 1, kind: input, shape index: {}]   ;;  %s1975_s2 = inlined_call_operand.vmem [shape: f32[128,384], index: 2, kind: input, shape index: {}]   ;;  %s1976_s3 = inlined_call_operand.vmem [shape: f32[2,256,128], index: 3, kind: input, shape index: {}]   ;;  %s1977_s4 = inlined_call_operand.vmem [shape: f32[2,1,128], index: 4, kind: input, shape index: {}]   ;;  %s1978_s5 = inlined_call_operand.vmem [shape: f32[32,128], index: 5, kind: output, shape index: {}]  }
   0x1   :  { %s1643_s20 = smov 0  }
   0x2 LB: > { %s24_s21 = sadd.s32 1, %s1602_s19  ;;  %p1100_p0 = scmp.ge.s32.totalorder %s1606_s20, 1  ;;  %s1606_s20 = sphi %s1643_s20, %s15_s20   ;;  %s1602_s19 = sphi %s1641_s19, %s1980_s19   ;;  %s1598_s18 = sphi %s1639_s18, %s1979_s18  }
   0x3   : > { %p25_p1 = scmp.ge.s32.totalorder %s24_s21, 2  ;;  %p200_p2 = scmp.lt.s32.totalorder %s1606_s20, 3 }
   0x5   : > { %s1982_s21 = smov (%p25_p1, %s24_s21), 0  ;;  %p201_p3 = pnand %p1100_p0, %p200_p2 }
   0x6   : > { %p1101_p4 = scmp.ne.s32.totalorder (!%p201_p3), %s1598_s18, 0 }
   0x7   : > { %204 = sbr.rel (%p201_p3) target bundleno = 972 (0x3cc), region = 40 }
   0xe   : > { %243 = sbr.rel (%p1101_p4) target bundleno = 706 (0x2c2), region = 44  ;;  %v249_v0 = vld [vmem:[%s1975_s2 + $0x8] sm:$0xff] (!%p1101_p4)  ;;  %v252_v1 = vld [vmem:[%s1975_s2 + $0x20] sm:$0xff] (!%p1101_p4)  ;;  %v251_v4 = vld [vmem:[%s1975_s2 + $0x18] sm:$0xff] (!%p1101_p4)  ;;  %v1608_v7 = vmov (!%p1101_p4), 0.0   ;;  %s1102_s17 = sshll.u32 (!%p1101_p4), %s1598_s18, 8 }
   0xf   : > { %v248_v2 = vld [vmem:[%s1975_s2] sm:$0xff] (!%p1101_p4)  ;;  %v1347_v3 = vpack.c.bf16 (!%p1101_p4), %v252_v1, %v249_v0  ;;  %v255_v5 = vld [vmem:[%s1975_s2 + $0x38] sm:$0xff] (!%p1101_p4)  ;;  %v258_v6 = vld [vmem:[%s1975_s2 + $0x50] sm:$0xff] (!%p1101_p4)  ;;  %361 = vmatprep.mubr.f32.mxu1 (!%p1101_p4), %v1608_v7  ;;  %s1841_s24 = scalar_lea.vmem (!%p1101_p4), %s1976_s3, %s1102_s17  ;;  %s839_s29 = scalar_lea.vmem (!%p1101_p4), %s1977_s4, %s1598_s18 }
  0x10   : > { %v1349_v8 = vpack.c.bf16 (!%p1101_p4), %v251_v4, %v248_v2  ;;  %v1351_v9 = vpack.c.bf16 (!%p1101_p4), %v258_v6, %v255_v5  ;;  %v254_v10 = vld [vmem:[%s1975_s2 + $0x30] sm:$0xff] (!%p1101_p4)  ;;  %v257_v11 = vld [vmem:[%s1975_s2 + $0x48] sm:$0xff] (!%p1101_p4)  ;;  %v264_v13 = vld [vmem:[%s1975_s2 + $0x80] sm:$0xff] (!%p1101_p4)  ;;  %p1104_p5 = scmp.ge.s32.totalorder (!%p1101_p4), %s1598_s18, 1 }
  0x11   : > { %v261_v12 = vld [vmem:[%s1975_s2 + $0x68] sm:$0xff] (!%p1101_p4)  ;;  %1348 = vmatprep.subr.bf16.mxu1 (!%p1101_p4), %v1347_v3  ;;  %v1353_v14 = vpack.c.bf16 (!%p1101_p4), %v257_v11, %v254_v10  ;;  %v260_v16 = vld [vmem:[%s1975_s2 + $0x60] sm:$0xff] (!%p1101_p4)  ;;  %v263_v17 = vld [vmem:[%s1975_s2 + $0x78] sm:$0xff] (!%p1101_p4) }
  0x12   : > { %1350 = vmatpush1.bf16.msra.mxu1 (!%p1101_p4), %v1349_v8  ;;  %v1355_v15 = vpack.c.bf16 (!%p1101_p4), %v264_v13, %v261_v12  ;;  %v267_v18 = vld [vmem:[%s1975_s2 + $0x98] sm:$0xff] (!%p1101_p4)  ;;  %v270_v19 = vld [vmem:[%s1975_s2 + $0xb0] sm:$0xff] (!%p1101_p4)  ;;  %v1357_v20 = vpack.c.bf16 (!%p1101_p4), %v263_v17, %v260_v16  ;;  %v269_v23 = vld [vmem:[%s1975_s2 + $0xa8] sm:$0xff] (!%p1101_p4)  ;;  %v487_v16 = vlaneseq (!%p1101_p4) }
  0x13   : > { %1352 = vmatprep.subr.bf16.mxu1 (!%p1101_p4), %v1351_v9  ;;  %v1359_v21 = vpack.c.bf16 (!%p1101_p4), %v270_v19, %v267_v18  ;;  %v266_v22 = vld [vmem:[%s1975_s2 + $0x90] sm:$0xff] (!%p1101_p4)  ;;  %v273_v24 = vld [vmem:[%s1975_s2 + $0xc8] sm:$0xff] (!%p1101_p4)  ;;  %v276_v25 = vld [vmem:[%s1975_s2 + $0xe0] sm:$0xff] (!%p1101_p4) }
  0x14   : > { %v1718_v26 = vld [vmem:[%s1973_s0] sm:$0xff] (!%p1101_p4)  ;;  %v1361_v27 = vpack.c.bf16 (!%p1101_p4), %v269_v23, %v266_v22  ;;  %v1363_v28 = vpack.c.bf16 (!%p1101_p4), %v276_v25, %v273_v24  ;;  %v275_v30 = vld [vmem:[%s1975_s2 + $0xd8] sm:$0xff] (!%p1101_p4)  ;;  %v282_v32 = vld [vmem:[%s1975_s2 + $0x110] sm:$0xff] (!%p1101_p4)  ;;  %v1845_v17 = vshrl.u32 (!%p1101_p4), %v487_v16, 7 }
  0x15   : > { %1265 = vmatprep.mubr.f32.mxu0 %v1718_v26  ;;  %v272_v29 = vld [vmem:[%s1975_s2 + $0xc0] sm:$0xff]  ;;  %v279_v31 = vld [vmem:[%s1975_s2 + $0xf8] sm:$0xff]  ;;  %v278_v35 = vld [vmem:[%s1975_s2 + $0xf0] sm:$0xff] }
  0x16   : > { %1354 = vmatpush1.bf16.msra.mxu1 %v1353_v14  ;;  %v1365_v33 = vpack.c.bf16 %v275_v30, %v272_v29  ;;  %v1367_v34 = vpack.c.bf16 %v282_v32, %v279_v31  ;;  %v281_v36 = vld [vmem:[%s1975_s2 + $0x108] sm:$0xff]  ;;  %v288_v38 = vld [vmem:[%s1975_s2 + $0x140] sm:$0xff]  ;;  %v287_v42 = vld [vmem:[%s1975_s2 + $0x138] sm:$0xff]  ;;  %v489_v18 = vsub.s32 0, %v1845_v17 }
  0x17   : > { %1356 = vmatprep.subr.bf16.mxu1 %v1355_v15  ;;  %v285_v37 = vld [vmem:[%s1975_s2 + $0x128] sm:$0xff]  ;;  %v1369_v39 = vpack.c.bf16 %v281_v36, %v278_v35  ;;  %v284_v41 = vld [vmem:[%s1975_s2 + $0x120] sm:$0xff]  ;;  %v291_v43 = vld [vmem:[%s1975_s2 + $0x158] sm:$0xff] }
  0x18   : > { %v1371_v40 = vpack.c.bf16 %v288_v38, %v285_v37  ;;  %v294_v44 = vld [vmem:[%s1975_s2 + $0x170] sm:$0xff]  ;;  %v1373_v45 = vpack.c.bf16 %v287_v42, %v284_v41  ;;  %v293_v48 = vld [vmem:[%s1975_s2 + $0x168] sm:$0xff]  ;;  %v256_v53 = vld [vmem:[%s1975_s2 + $0x40] sm:$0xff] }
  0x19   : > { %v1375_v46 = vpack.c.bf16 %v294_v44, %v291_v43  ;;  %v290_v47 = vld [vmem:[%s1975_s2 + $0x150] sm:$0xff]  ;;  %v253_v50 = vld [vmem:[%s1975_s2 + $0x28] sm:$0xff]  ;;  %v259_v54 = vld [vmem:[%s1975_s2 + $0x58] sm:$0xff] }
  0x1a   : > { %1358 = vmatpush1.bf16.msra.mxu1 %v1357_v20  ;;  %v250_v49 = vld [vmem:[%s1975_s2 + $0x10] sm:$0xff]  ;;  %v1377_v51 = vpack.c.bf16 %v293_v48, %v290_v47  ;;  %v1383_v55 = vpack.c.bf16 %v259_v54, %v256_v53  ;;  %v265_v57 = vld [vmem:[%s1975_s2 + $0x88] sm:$0xff]  ;;  %v268_v60 = vld [vmem:[%s1975_s2 + $0xa0] sm:$0xff] }
  0x1b   : > { %1360 = vmatprep.subr.bf16.mxu1 %v1359_v21  ;;  %v1379_v52 = vpack.c.bf16 %v253_v50, %v250_v49  ;;  %v262_v56 = vld [vmem:[%s1975_s2 + $0x70] sm:$0xff]  ;;  %v1786_v58 = vld [vmem:[%s1973_s0 + $0x8] sm:$0xff]  ;;  %v271_v61 = vld [vmem:[%s1975_s2 + $0xb8] sm:$0xff]  ;;  %v509_v21 = vsub.s32 1, %v1845_v17 }
  0x1c   : > { %v1387_v59 = vpack.c.bf16 %v265_v57, %v262_v56  ;;  %v1799_v62 = vld [vmem:[%s1973_s0 + $0x10] sm:$0xff]  ;;  %v1391_v63 = vpack.c.bf16 %v271_v61, %v268_v60  ;;  %v277_v1 = vld [vmem:[%s1975_s2 + $0xe8] sm:$0xff]  ;;  %v1812_v2 = vld [vmem:[%s1973_s0 + $0x18] sm:$0xff] }
  0x1d   : > { %v274_v0 = vld [vmem:[%s1975_s2 + $0xd0] sm:$0xff]  ;;  %v280_v4 = vld [vmem:[%s1975_s2 + $0x100] sm:$0xff]  ;;  %v283_v5 = vld [vmem:[%s1975_s2 + $0x118] sm:$0xff] }
  0x1e   : > { %1362 = vmatpush1.bf16.msra.mxu1 %v1361_v27  ;;  %v1395_v3 = vpack.c.bf16 %v277_v1, %v274_v0  ;;  %v1399_v6 = vpack.c.bf16 %v283_v5, %v280_v4  ;;  %v289_v8 = vld [vmem:[%s1975_s2 + $0x148] sm:$0xff]  ;;  %v292_v10 = vld [vmem:[%s1975_s2 + $0x160] sm:$0xff]  ;;  %v295_v11 = vld [vmem:[%s1975_s2 + $0x178] sm:$0xff] }
  0x1f   : > { %1364 = vmatprep.subr.bf16.mxu1 %v1363_v28  ;;  %v1407_v12 = vpack.c.bf16 %v295_v11, %v292_v10  ;;  %v653_v13 = vld [vmem:[%s1841_s24 + $0x80] sm:$0xff]  ;;  %v654_v14 = vld [vmem:[%s1841_s24 + $0x88] sm:$0xff]  ;;  %v659_v49 = vld [vmem:[%s1841_s24 + $0xb0] sm:$0xff] }
  0x20   : > { %v1411_v15 = vpack.c.bf16 %v654_v14, %v653_v13  ;;  %v1851_v19 = vld [vmem:[%s1974_s1] sm:$0xff]  ;;  %v658_v44 = vld [vmem:[%s1841_s24 + $0xa8] sm:$0xff]  ;;  %v660_v50 = vld [vmem:[%s1841_s24 + $0xb8] sm:$0xff] }
  0x21   : > { %v490_v20 = vrot.slane %v1851_v19, %v489_v18  ;;  %v510_v25 = vrot.slane %v1851_v19, %v509_v21  ;;  %v657_v43 = vld [vmem:[%s1841_s24 + $0xa0] sm:$0xff]  ;;  %v662_v53 = vld [vmem:[%s1841_s24 + $0xc8] sm:$0xff]  ;;  %v664_v56 = vld [vmem:[%s1841_s24 + $0xd8] sm:$0xff] }
  0x22   : > { %1366 = vmatpush1.bf16.msra.mxu1 %v1365_v33  ;;  %1412 = vmatprep.subr.bf16.mxu0 %v1411_v15  ;;  %v1419_v47 = vpack.c.bf16 %v658_v44, %v657_v43  ;;  %v666_v60 = vld [vmem:[%s1841_s24 + $0xe8] sm:$0xff]  ;;  %v668_v0 = vld [vmem:[%s1841_s24 + $0xf8] sm:$0xff]  ;;  %v643_v13 = vld [vmem:[%s1841_s24 + $0x30] sm:$0xff] }
  0x23   : > { %1368 = vmatprep.subr.bf16.mxu1 %v1367_v34  ;;  %1414 = vmatpush3.bf16.msra.mxu0 %v1411_v15  ;;  %v638_v4 = vld [vmem:[%s1841_s24 + $0x8] sm:$0xff]  ;;  %v644_v14 = vld [vmem:[%s1841_s24 + $0x38] sm:$0xff]  ;;  %v645_v15 = vld [vmem:[%s1841_s24 + $0x40] sm:$0xff] }
  0x24   : > { %v642_v11 = vld [vmem:[%s1841_s24 + $0x28] sm:$0xff]  ;;  %v647_v18 = vld [vmem:[%s1841_s24 + $0x50] sm:$0xff] }
  0x25   : > { %v646_v16 = vld [vmem:[%s1841_s24 + $0x48] sm:$0xff] }
  0x26   : > { %1370 = vmatpush1.bf16.msra.mxu1 %v1369_v39  ;;  %v655_v39 = vld [vmem:[%s1841_s24 + $0x90] sm:$0xff] }
  0x27   : > { %1372 = vmatprep.subr.bf16.mxu1 %v1371_v40  ;;  %v656_v40 = vld [vmem:[%s1841_s24 + $0x98] sm:$0xff] }
  0x28   : > { %v1415_v42 = vpack.c.bf16 %v656_v40, %v655_v39 }
  0x2a   : > { %1374 = vmatpush1.bf16.msra.mxu1 %v1373_v45  ;;  %1416 = vmatprep.subr.bf16.mxu0 %v1415_v42 }
  0x2b   : > { %1376 = vmatprep.subr.bf16.mxu1 %v1375_v46  ;;  %1418 = vmatpush3.bf16.msra.mxu0 %v1415_v42 }
  0x2c   : > { %1420 = vmatprep.subr.bf16.mxu0 %v1419_v47 }
  0x2e   : > { %1378 = vmatpush1.bf16.msra.mxu1 %v1377_v51  ;;  %v1423_v51 = vpack.c.bf16 %v660_v50, %v659_v49 }
  0x2f   : > { %1380 = vmatprep.subr.bf16.mxu1 %v1379_v52  ;;  %1422 = vmatpush3.bf16.msra.mxu0 %v1419_v47 }
  0x30   : > { %1424 = vmatprep.subr.bf16.mxu0 %v1423_v51 }
  0x31   : > { %362 = vmatmul.mubr.f32.vlgmr.msra.gmra.mrb[0].mxu1 %v1718_v26 }
  0x32   : > { %367 = vmatprep.mubr.f32.mxu1 %v1608_v7  ;;  %1382 = vmatpush3.bf16.msra.mxu1 %v1379_v52  ;;  %v661_v52 = vld [vmem:[%s1841_s24 + $0xc0] sm:$0xff] }
  0x33   : > { %1384 = vmatprep.subr.bf16.mxu1 %v1383_v55  ;;  %1426 = vmatpush3.bf16.msra.mxu0 %v1423_v51  ;;  %v1427_v54 = vpack.c.bf16 %v662_v53, %v661_v52 }
  0x35   : > { %368 = vmatmul.mubr.f32.gmra.mrb[2].mxu1 %v1786_v58  ;;  %1428 = vmatprep.subr.bf16.mxu0 %v1427_v54 }
  0x36   : > { %373 = vmatprep.mubr.f32.mxu1 %v1608_v7  ;;  %1386 = vmatpush3.bf16.msra.mxu1 %v1383_v55  ;;  %v663_v55 = vld [vmem:[%s1841_s24 + $0xd0] sm:$0xff] }
  0x37   : > { %1388 = vmatprep.subr.bf16.mxu1 %v1387_v59  ;;  %1430 = vmatpush3.bf16.msra.mxu0 %v1427_v54  ;;  %v1431_v57 = vpack.c.bf16 %v664_v56, %v663_v55 }
  0x39   : > { %374 = vmatmul.mubr.f32.gmra.mrb[4].mxu1 %v1799_v62  ;;  %1432 = vmatprep.subr.bf16.mxu0 %v1431_v57 }
  0x3a   : > { %379 = vmatprep.mubr.f32.mxu1 %v1608_v7  ;;  %1390 = vmatpush3.bf16.msra.mxu1 %v1387_v59  ;;  %v286_v7 = vld [vmem:[%s1975_s2 + $0x130] sm:$0xff]  ;;  %v665_v59 = vld [vmem:[%s1841_s24 + $0xe0] sm:$0xff] }
  0x3b   : > { %1392 = vmatprep.subr.bf16.mxu1 %v1391_v63  ;;  %v1403_v9 = vpack.c.bf16 %v289_v8, %v286_v7  ;;  %1434 = vmatpush3.bf16.msra.mxu0 %v1431_v57  ;;  %v1435_v61 = vpack.c.bf16 %v666_v60, %v665_v59  ;;  %v640_v7 = vld [vmem:[%s1841_s24 + $0x18] sm:$0xff]  ;;  %v641_v8 = vld [vmem:[%s1841_s24 + $0x20] sm:$0xff] }
  0x3d   : > { %380 = vmatmul.mubr.f32.gmra.mrb[6].mxu1 %v1812_v2  ;;  %1436 = vmatprep.subr.bf16.mxu0 %v1435_v61 }
  0x3e   : > { %1394 = vmatpush3.bf16.msra.mxu1 %v1391_v63  ;;  %1227 = vmatprep.mubr.f32.mxu1 %v1718_v26  ;;  %v667_v63 = vld [vmem:[%s1841_s24 + $0xf0] sm:$0xff] }
  0x3f   : > { %1396 = vmatprep.subr.bf16.mxu1 %v1395_v3  ;;  %1438 = vmatpush3.bf16.msra.mxu0 %v1435_v61  ;;  %v1439_v1 = vpack.c.bf16 %v668_v0, %v667_v63 }
  0x41   : > { %1440 = vmatprep.subr.bf16.mxu0 %v1439_v1 }
  0x42   : > { %1398 = vmatpush3.bf16.msra.mxu1 %v1395_v3  ;;  %v637_v3 = vld [vmem:[%s1841_s24] sm:$0xff] }
  0x43   : > { %1400 = vmatprep.subr.bf16.mxu1 %v1399_v6  ;;  %1442 = vmatpush3.bf16.msra.mxu0 %v1439_v1  ;;  %v1443_v5 = vpack.c.bf16 %v638_v4, %v637_v3 }
  0x45   : > { %1444 = vmatprep.subr.bf16.mxu0 %v1443_v5 }
  0x46   : > { %1402 = vmatpush3.bf16.msra.mxu1 %v1399_v6  ;;  %1266 = vmatmul.mubr.f32.vlgmr.msra.gmra.mrb[0].mxu0 %v1786_v58  ;;  %v639_v6 = vld [vmem:[%s1841_s24 + $0x10] sm:$0xff] }
  0x47   : > { %1404 = vmatprep.subr.bf16.mxu1 %v1403_v9  ;;  %1446 = vmatpush3.bf16.msra.mxu0 %v1443_v5  ;;  %v1447_v10 = vpack.c.bf16 %v640_v7, %v639_v6 }
  0x48   : > { %1268 = vmatprep.mubr.f32.mxu0 %v1799_v62 }
  0x49   : > { %1448 = vmatprep.subr.bf16.mxu0 %v1447_v10 }
  0x4a   : > { %1406 = vmatpush3.bf16.msra.mxu1 %v1403_v9  ;;  %1269 = vmatmul.mubr.f32.gmra.mrb[2].mxu0 %v1812_v2 }
  0x4b   : > { %1408 = vmatprep.subr.bf16.mxu1 %v1407_v12  ;;  %1450 = vmatpush3.bf16.msra.mxu0 %v1447_v10 }
  0x4e   : > { %1410 = vmatpush3.bf16.msra.mxu1 %v1407_v12  ;;  %v1451_v12 = vpack.c.bf16 %v642_v11, %v641_v8 }
  0x50   : > { %1452 = vmatprep.subr.bf16.mxu0 %v1451_v12 }
  0x51   : > { %1228 = vmatmul.mubr.f32.vlgmr.msra.gmra.mrb[8].mxu1 %v1786_v58  ;;  %v1455_v58 = vpack.c.bf16 %v644_v14, %v643_v13  ;;  %1454 = vmatpush3.bf16.msra.mxu0 %v1451_v12 }
  0x52   : > { %1230 = vmatprep.mubr.f32.mxu1 %v1799_v62  ;;  %v1459_v62 = vpack.c.bf16 %v646_v16, %v645_v15 }
  0x53   : > { %1456 = vmatprep.subr.bf16.mxu0 %v1455_v58 }
  0x55   : > { %1231 = vmatmul.mubr.f32.gmra.mrb[10].mxu1 %v1812_v2  ;;  %1458 = vmatpush3.bf16.msra.mxu0 %v1455_v58 }
  0x56   : > { %1460 = vmatprep.subr.bf16.mxu0 %v1459_v62 }
  0x59   : > { %1462 = vmatpush3.bf16.msra.mxu0 %v1459_v62 }
 0x104   : > { %v363_v22 = vpop.f32.mrb[0].mxu1 }
 0x105   : > { %v365_v23 = vpop.f32.mrb[1].mxu1  ;;  %v491_v24 = vmul.f32 %v490_v20, %v363_v22  ;;  %v511_v29 = vmul.f32 %v510_v25, %v363_v22 }
 0x106   : > { %v471_v26 = vmul.f32 %v365_v23, %v363_v22  ;;  %v649_v22 = vld [vmem:[%s1841_s24 + $0x60] sm:$0xff]  ;;  %v650_v23 = vld [vmem:[%s1841_s24 + $0x68] sm:$0xff] }
 0x107   : > { %495 = vadd.xlane.f32.xlu0 %v491_v24  ;;  %v1467_v24 = vpack.c.bf16 %v650_v23, %v649_v22 }
 0x108   : > { %v369_v27 = vpop.f32.mrb[2].mxu1 }
 0x109   : > { %v371_v28 = vpop.f32.mrb[3].mxu1  ;;  %v492_v30 = vmul.f32 %v490_v20, %v369_v27  ;;  %v512_v33 = vmul.f32 %v510_v25, %v369_v27 }
 0x10a   : > { %v472_v31 = vmul.f32 %v371_v28, %v369_v27 }
 0x10b   : > { %515 = vadd.xlane.f32.xlu0 %v511_v29  ;;  %497 = vadd.xlane.f32.xlu1 %v492_v30 }
 0x10c   : > { %v375_v32 = vpop.f32.mrb[4].mxu1 }
 0x10d   : > { %v377_v34 = vpop.f32.mrb[5].mxu1  ;;  %v493_v41 = vmul.f32 %v490_v20, %v375_v32  ;;  %v513_v46 = vmul.f32 %v510_v25, %v375_v32 }
 0x10e   : > { %v473_v35 = vmul.f32 %v377_v34, %v375_v32 }
 0x10f   : > { %475 = vadd.xlane.f32.xlu0 %v471_v26  ;;  %517 = vadd.xlane.f32.xlu1 %v512_v33  ;;  %v652_v26 = vld [vmem:[%s1841_s24 + $0x78] sm:$0xff] }
 0x110   : > { %v381_v36 = vpop.f32.mrb[6].mxu1 }
 0x111   : > { %v383_v37 = vpop.f32.mrb[7].mxu1  ;;  %v494_v45 = vmul.f32 %v490_v20, %v381_v36  ;;  %v514_v48 = vmul.f32 %v510_v25, %v381_v36  ;;  %v648_v20 = vld [vmem:[%s1841_s24 + $0x58] sm:$0xff]  ;;  %v651_v25 = vld [vmem:[%s1841_s24 + $0x70] sm:$0xff] }
 0x112   : > { %v474_v38 = vmul.f32 %v383_v37, %v381_v36  ;;  %v1463_v21 = vpack.c.bf16 %v648_v20, %v647_v18  ;;  %v1471_v27 = vpack.c.bf16 %v652_v26, %v651_v25 }
 0x113   : > { %477 = vadd.xlane.f32.xlu1 %v472_v31  ;;  %479 = vadd.xlane.f32.xlu0 %v473_v35 }
 0x114   : > { %1464 = vmatprep.subr.bf16.mxu0 %v1463_v21 }
 0x115   : > { %1466 = vmatpush3.bf16.msra.mxu0 %v1463_v21 }
 0x116   : > { %1468 = vmatprep.subr.bf16.mxu0 %v1467_v24 }
 0x117   : > { %499 = vadd.xlane.f32.xlu1 %v493_v41  ;;  %481 = vadd.xlane.f32.xlu0 %v474_v38 }
 0x119   : > { %1470 = vmatpush3.bf16.msra.mxu0 %v1467_v24 }
 0x11a   : > { %1472 = vmatprep.subr.bf16.mxu0 %v1471_v27 }
 0x11b   : > { %501 = vadd.xlane.f32.xlu1 %v494_v45  ;;  %519 = vadd.xlane.f32.xlu0 %v513_v46 }
 0x11d   : > { %1474 = vmatpush3.bf16.msra.mxu0 %v1471_v27 }
 0x11f   : > { %521 = vadd.xlane.f32.xlu1 %v514_v48 }
 0x124   : > { %v1876_v9 = vpop.f32.mrb[8].mxu1 }
 0x125   : > { %v1887_v2 = vpop.f32.mrb[9].mxu1 }
 0x128   : > { %v1893_v28 = vpop.f32.mrb[10].mxu1 }
 0x129   : > { %v1895_v29 = vpop.f32.mrb[11].mxu1 }
 0x194   : > { %v496_v30 = vpop.xlane.xlu0 %495 }
 0x195   : > { %v503_v35 = vmul.f32 0.088388346, %v496_v30 }
 0x198   : > { %v516_v31 = vpop.xlane.xlu0 %515  ;;  %v498_v32 = vpop.xlane.xlu1 %497 }
 0x199   : > { %v523_v37 = vmul.f32 0.088388346, %v516_v31  ;;  %v504_v41 = vmul.f32 0.088388346, %v498_v32 }
 0x19c   : > { %v476_v33 = vpop.xlane.xlu0 %475  ;;  %v518_v34 = vpop.xlane.xlu1 %517 }
 0x19d   : > { %v483_v36 = vmul.f32 0.088388346, %v476_v33  ;;  %v524_v44 = vmul.f32 0.088388346, %v518_v34 }
 0x19f   : > { %v527_v38 = vmax.f32 %v483_v36, %v503_v35 }
 0x1a0   : > { %v478_v39 = vpop.xlane.xlu1 %477  ;;  %v480_v40 = vpop.xlane.xlu0 %479 }
 0x1a1   : > { %v531_v42 = vmax.f32 %v527_v38, %v523_v37  ;;  %v484_v43 = vmul.f32 0.088388346, %v478_v39  ;;  %v485_v55 = vmul.f32 0.088388346, %v480_v40 }
 0x1a3   : > { %v535_v45 = vsub.f32 %v483_v36, %v531_v42  ;;  %v547_v46 = vsub.f32 %v503_v35, %v531_v42  ;;  %v559_v47 = vsub.f32 %v523_v37, %v531_v42  ;;  %v528_v48 = vmax.f32 %v484_v43, %v504_v41 }
 0x1a4   : > { %v500_v49 = vpop.xlane.xlu1 %499  ;;  %v482_v50 = vpop.xlane.xlu0 %481 }
 0x1a5   : > { %v539_v51 = vmul.f32 1.442695, %v535_v45  ;;  %v551_v52 = vmul.f32 1.442695, %v547_v46  ;;  %v532_v53 = vmax.f32 %v528_v48, %v524_v44  ;;  %v563_v54 = vmul.f32 1.442695, %v559_v47 }
 0x1a6   : > { %v505_v56 = vmul.f32 0.088388346, %v500_v49  ;;  %v486_v7 = vmul.f32 0.088388346, %v482_v50  ;;  %v609_v48 = vsub.s32 2, %v1845_v17 }
 0x1a7   : > { %1552 = vpow2.f32 %v539_v51  ;;  %v536_v57 = vsub.f32 %v484_v43, %v532_v53  ;;  %v548_v59 = vsub.f32 %v504_v41, %v532_v53  ;;  %v560_v60 = vsub.f32 %v524_v44, %v532_v53 }
 0x1a8   : > { %1554 = vpow2.f32 %v551_v52  ;;  %v502_v61 = vpop.xlane.xlu1 %501  ;;  %v520_v63 = vpop.xlane.xlu0 %519  ;;  %v529_v3 = vmax.f32 %v485_v55, %v505_v56  ;;  %v625_v52 = vsub.s32 3, %v1845_v17 }
 0x1a9   : > { %v541_v0 = vmul.f32 1.442695, %v536_v57  ;;  %v553_v1 = vmul.f32 1.442695, %v548_v59  ;;  %1556 = vpow2.f32 %v563_v54  ;;  %v565_v4 = vmul.f32 1.442695, %v560_v60 }
 0x1aa   : > { %v506_v5 = vmul.f32 0.088388346, %v502_v61  ;;  %v525_v6 = vmul.f32 0.088388346, %v520_v63  ;;  %v626_v59 = vrot.slane %v1851_v19, %v625_v52 }
 0x1ab   : > { %1558 = vpow2.f32 %v541_v0 }
 0x1ac   : > { %1560 = vpow2.f32 %v553_v1  ;;  %v533_v8 = vmax.f32 %v529_v3, %v525_v6  ;;  %v522_v10 = vpop.xlane.xlu1 %521  ;;  %v530_v11 = vmax.f32 %v486_v7, %v506_v5 }
 0x1ad   : > { %v526_v12 = vmul.f32 0.088388346, %v522_v10  ;;  %1562 = vpow2.f32 %v565_v4 }
 0x1ae   : > { %v537_v13 = vsub.f32 %v485_v55, %v533_v8  ;;  %v549_v14 = vsub.f32 %v505_v56, %v533_v8  ;;  %v561_v58 = vsub.f32 %v525_v6, %v533_v8  ;;  %v610_v55 = vrot.slane %v1851_v19, %v609_v48 }
 0x1af   : > { %v534_v15 = vmax.f32 %v530_v11, %v526_v12 }
 0x1b0   : > { %v543_v16 = vmul.f32 1.442695, %v537_v13  ;;  %v555_v62 = vmul.f32 1.442695, %v549_v14  ;;  %v567_v18 = vmul.f32 1.442695, %v561_v58 }
 0x1b1   : > { %v1553_v20 = vpop.eup %1552  ;;  %v538_v21 = vsub.f32 %v486_v7, %v534_v15  ;;  %v550_v22 = vsub.f32 %v506_v5, %v534_v15  ;;  %v562_v23 = vsub.f32 %v526_v12, %v534_v15 }
 0x1b2   : > { %v1555_v24 = vpop.eup %1554  ;;  %1564 = vpow2.f32 %v543_v16 }
 0x1b3   : > { %1566 = vpow2.f32 %v555_v62  ;;  %v545_v25 = vmul.f32 1.442695, %v538_v21  ;;  %v557_v26 = vmul.f32 1.442695, %v550_v22  ;;  %v569_v27 = vmul.f32 1.442695, %v562_v23  ;;  %v1557_v30 = vpop.eup %1556 }
 0x1b4   : > { %1568 = vpow2.f32 %v567_v18  ;;  %v571_v31 = vadd.f32 %v1555_v24, %v1553_v20 }
 0x1b5   : > { %v1559_v32 = vpop.eup %1558  ;;  %1570 = vpow2.f32 %v545_v25 }
 0x1b6   : > { %v1561_v33 = vpop.eup %1560  ;;  %1572 = vpow2.f32 %v557_v26  ;;  %v575_v34 = vadd.f32 %v1557_v30, %v571_v31 }
 0x1b7   : > { %1574 = vpow2.f32 %v569_v27  ;;  %v572_v35 = vadd.f32 %v1561_v33, %v1559_v32  ;;  %v1563_v36 = vpop.eup %1562 }
 0x1b8   : > { %1576 = vrcp.f32 %v575_v34 }
 0x1b9   : > { %v576_v37 = vadd.f32 %v1563_v36, %v572_v35 }
 0x1bb   : > { %1578 = vrcp.f32 %v576_v37 }
 0x1bc   : > { %v1565_v38 = vpop.eup %1564 }
 0x1bd   : > { %v1567_v39 = vpop.eup %1566 }
 0x1be   : > { %v1569_v40 = vpop.eup %1568  ;;  %v573_v41 = vadd.f32 %v1567_v39, %v1565_v38 }
 0x1bf   : > { %v1571_v42 = vpop.eup %1570 }
 0x1c0   : > { %v1573_v43 = vpop.eup %1572  ;;  %v577_v44 = vadd.f32 %v1569_v40, %v573_v41 }
 0x1c1   : > { %v1575_v45 = vpop.eup %1574  ;;  %v574_v46 = vadd.f32 %v1573_v43, %v1571_v42 }
 0x1c2   : > { %v1577_v47 = vpop.eup %1576  ;;  %1580 = vrcp.f32 %v577_v44 }
 0x1c3   : > { %v583_v49 = vmul.f32 %v1577_v47, %v575_v34  ;;  %v578_v50 = vadd.f32 %v1575_v45, %v574_v46 }
 0x1c5   : > { %v1579_v51 = vpop.eup %1578  ;;  %v587_v53 = vsub.f32 2.0, %v583_v49  ;;  %1582 = vrcp.f32 %v578_v50 }
 0x1c6   : > { %v584_v54 = vmul.f32 %v1579_v51, %v576_v37 }
 0x1c7   : > { %v591_v56 = vmul.f32 %v1577_v47, %v587_v53 }
 0x1c8   : > { %v588_v57 = vsub.f32 2.0, %v584_v54 }
 0x1c9   : > { %v595_v60 = vmul.f32 %v1553_v20, %v591_v56  ;;  %v603_v61 = vmul.f32 %v1555_v24, %v591_v56  ;;  %v619_v63 = vmul.f32 %v1557_v30, %v591_v56 }
 0x1ca   : > { %v592_v0 = vmul.f32 %v1579_v51, %v588_v57 }
 0x1cb   : > { %v599_v1 = vmul.f32 %v595_v60, %v1887_v2  ;;  %v611_v3 = vmul.f32 %v610_v55, %v603_v61  ;;  %v627_v8 = vmul.f32 %v626_v59, %v619_v63 }
 0x1cc   : > { %v1581_v4 = vpop.eup %1580  ;;  %v596_v5 = vmul.f32 %v1559_v32, %v592_v0  ;;  %v604_v6 = vmul.f32 %v1561_v33, %v592_v0  ;;  %v620_v17 = vmul.f32 %v1563_v36, %v592_v0 }
 0x1cd   : > { %v615_v7 = vadd.f32 %v611_v3, %v599_v1  ;;  %v585_v10 = vmul.f32 %v1581_v4, %v577_v44 }
 0x1ce   : > { %v600_v11 = vmul.f32 %v1876_v9, %v596_v5  ;;  %v612_v12 = vmul.f32 %v610_v55, %v604_v6  ;;  %v628_v15 = vmul.f32 %v626_v59, %v620_v17 }
 0x1cf   : > { %v1583_v13 = vpop.eup %1582  ;;  %v631_v14 = vadd.f32 %v627_v8, %v615_v7  ;;  %v589_v19 = vsub.f32 2.0, %v585_v10 }
 0x1d0   : > { %v616_v58 = vadd.f32 %v612_v12, %v600_v11  ;;  %v586_v16 = vmul.f32 %v1583_v13, %v578_v50 }
 0x1d1   : > { %1303 = vmatprep.mubr.f32.mxu0 %v631_v14  ;;  %v593_v62 = vmul.f32 %v1581_v4, %v589_v19 }
 0x1d2   : > { %v632_v2 = vadd.f32 %v628_v15, %v616_v58  ;;  %v590_v18 = vsub.f32 2.0, %v586_v16 }
 0x1d3   : > { %v597_v20 = vmul.f32 %v1565_v38, %v593_v62  ;;  %v605_v21 = vmul.f32 %v1567_v39, %v593_v62  ;;  %v621_v22 = vmul.f32 %v1569_v40, %v593_v62 }
 0x1d4   : > { %v594_v23 = vmul.f32 %v1583_v13, %v590_v18  ;;  %1304 = vmatmul.mubr.f32.vlgmr.msra.gmra.mrb[0].mxu0 %v632_v2 }
 0x1d5   : > { %v601_v24 = vmul.f32 %v597_v20, %v1895_v29  ;;  %v613_v9 = vmul.f32 %v610_v55, %v605_v21  ;;  %v629_v31 = vmul.f32 %v626_v59, %v621_v22  ;;  %v1103_v29 = vld [vmem:[%s839_s29] ss:$0 sm:$0xff] }
 0x1d6   : > { %v598_v25 = vmul.f32 %v1571_v42, %v594_v23  ;;  %v606_v26 = vmul.f32 %v1573_v43, %v594_v23  ;;  %v622_v27 = vmul.f32 %v1575_v45, %v594_v23 }
 0x1d7   : > { %v617_v30 = vadd.f32 %v613_v9, %v601_v24 }
 0x1d8   : > { %v602_v32 = vmul.f32 %v1893_v28, %v598_v25  ;;  %v614_v33 = vmul.f32 %v610_v55, %v606_v26  ;;  %v630_v36 = vmul.f32 %v626_v59, %v622_v27 }
 0x1d9   : > { %v633_v34 = vadd.f32 %v629_v31, %v617_v30 }
 0x1da   : > { %v618_v35 = vadd.f32 %v614_v33, %v602_v32 }
 0x1db   : > { %1306 = vmatprep.mubr.f32.mxu0 %v633_v34 }
 0x1dc   : > { %v634_v37 = vadd.f32 %v630_v36, %v618_v35 }
 0x1de   : > { %1307 = vmatmul.mubr.f32.gmra.mrb[2].mxu0 %v634_v37 }
 0x2a7   : > { %v1305_v38 = vpop.f32.mrb[0].mxu0 }
 0x2a8   : > { %v848_v39 = vadd.f32 %v1305_v38, %v1103_v29  ;;  %v820_v40 = vpop.f32.mrb[1].mxu0 }
 0x2a9   : > { %v847_v41 = vadd.f32 %v1103_v29, %v820_v40 }
 0x2aa   : > { %vm856_vm1 = vcmp.ge.f32.partialorder (!%p1104_p5), %v848_v39, 0.0  ;;  %v860_v46 = vmul.f32 (!%p1104_p5), 0.01, %v848_v39 }
 0x2ab   : > { %vm855_vm0 = vcmp.ge.f32.partialorder (!%p1104_p5), %v847_v41, 0.0  ;;  %v859_v45 = vmul.f32 (!%p1104_p5), 0.01, %v847_v41 }
 0x2ac   : > { %v864_v50 = vsel (!%p1104_p5), %vm856_vm1, %v848_v39, %v860_v46 }
 0x2ad   : > { %854 = sbr.rel (%p1104_p5) target bundleno = 697 (0x2b9), region = 48  ;;  %v863_v49 = vsel (!%p1104_p5), %vm855_vm0, %v847_v41, %v859_v45  ;;  %868 = vst [vmem:[#allocation2 + $0x8] sm:$0xff] (!%p1104_p5), %v864_v50 }
 0x2ae   : > { %867 = vst [vmem:[#allocation2] sm:$0xff] (!%p1104_p5), %v863_v49 }
 0x2b1   : > { %v1308_v42 = vpop.f32.mrb[2].mxu0 }
 0x2b2   : > { %v850_v43 = vadd.f32 %v1308_v42, %v1103_v29  ;;  %v830_v44 = vpop.f32.mrb[3].mxu0 }
 0x2b3   : > { %v849_v28 = vadd.f32 %v1103_v29, %v830_v44 }
 0x2b4   : > { %vm858_vm3 = vcmp.ge.f32.partialorder %v850_v43, 0.0  ;;  %v862_v48 = vmul.f32 0.01, %v850_v43 }
 0x2b5   : > { %vm857_vm2 = vcmp.ge.f32.partialorder %v849_v28, 0.0  ;;  %v861_v47 = vmul.f32 0.01, %v849_v28 }
 0x2b6   : > { %v866_v52 = vsel %vm858_vm3, %v850_v43, %v862_v48 }
 0x2b7   : > { %v865_v51 = vsel %vm857_vm2, %v849_v28, %v861_v47  ;;  %870 = vst [vmem:[#allocation2 + $0x18] sm:$0xff] %v866_v52 }
 0x2b8   : > { %869 = vst [vmem:[#allocation2 + $0x10] sm:$0xff] %v865_v51 }
 0x2b9 PF: > { %p1105_p6 = scmp.ne.s32.totalorder %s1598_s18, 1 }
 0x2ba   : > { %875 = vst [vmem:[%s1978_s5] sm:$0xff] (!%p1105_p6), %v847_v41  ;;  %876 = vst [vmem:[%s1978_s5 + $0x8] sm:$0xff] (!%p1105_p6), %v848_v39 }
 0x2bb   : > { %874 = sbr.rel (%p1105_p6) target bundleno = 706 (0x2c2), region = 52  ;;  %877 = vst [vmem:[%s1978_s5 + $0x10] sm:$0xff] (!%p1105_p6), %v849_v28  ;;  %878 = vst [vmem:[%s1978_s5 + $0x18] sm:$0xff] (!%p1105_p6), %v850_v43 }
 0x2c2 PF: > { %p1106_p7 = scmp.le.s32.totalorder %s1598_s18, 0 }
 0x2c3   : > { %s1107_s13 = sshll.u32 (!%p1106_p7), %s1598_s18, 8  ;;  %v883_v53 = vld [vmem:[#allocation2] sm:$0xff] (!%p1106_p7)  ;;  %v885_v54 = vld [vmem:[#allocation2 + $0x10] sm:$0xff] (!%p1106_p7)  ;;  %v884_v16 = vld [vmem:[#allocation2 + $0x8] sm:$0xff] (!%p1106_p7)  ;;  %s905_s23 = scalar_lea.vmem (!%p1106_p7), %s1977_s4, %s1598_s18 }
 0x2c4   : > { %882 = sbr.rel (%p1106_p7) target bundleno = 972 (0x3cc), region = 56  ;;  %s1928_s16 = scalar_lea.vmem (!%p1106_p7), %s1976_s3, %s1107_s13  ;;  %1341 = vmatprep.mubr.f32.mxu0 (!%p1106_p7), %v883_v53  ;;  %1344 = vmatprep.mubr.f32.mxu1 (!%p1106_p7), %v885_v54  ;;  %v886_v62 = vld [vmem:[#allocation2 + $0x18] sm:$0xff] (!%p1106_p7)  ;;  %v1108_v2 = vld [vmem:[%s905_s23] ss:$0 sm:$0xff] (!%p1106_p7) }
 0x2c5   : > { %v889_v55 = vld [vmem:[%s1928_s16] sm:$0xff] (!%p1106_p7)  ;;  %v890_v56 = vld [vmem:[%s1928_s16 + $0x8] sm:$0xff] (!%p1106_p7)  ;;  %v891_v57 = vld [vmem:[%s1928_s16 + $0x10] sm:$0xff] (!%p1106_p7)  ;;  %p1109_p8 = scmp.ge.s32.totalorder (!%p1106_p7), %s1598_s18, 1 }
 0x2c6   : > { %v1475_v59 = vpack.c.bf16 (!%p1106_p7), %v890_v56, %v889_v55  ;;  %v892_v60 = vld [vmem:[%s1928_s16 + $0x18] sm:$0xff] (!%p1106_p7)  ;;  %v893_v63 = vld [vmem:[%s1928_s16 + $0x20] sm:$0xff] (!%p1106_p7)  ;;  %v894_v0 = vld [vmem:[%s1928_s16 + $0x28] sm:$0xff] (!%p1106_p7) }
 0x2c7   : > { %v1479_v61 = vpack.c.bf16 (!%p1106_p7), %v892_v60, %v891_v57  ;;  %v1483_v1 = vpack.c.bf16 (!%p1106_p7), %v894_v0, %v893_v63  ;;  %v895_v3 = vld [vmem:[%s1928_s16 + $0x30] sm:$0xff] (!%p1106_p7)  ;;  %v896_v4 = vld [vmem:[%s1928_s16 + $0x38] sm:$0xff] (!%p1106_p7)  ;;  %v897_v6 = vld [vmem:[%s1928_s16 + $0x40] sm:$0xff] (!%p1106_p7) }
 0x2c8   : > { %1476 = vmatprep.subr.bf16.mxu0 (!%p1106_p7), %v1475_v59  ;;  %1511 = vmatprep.subr.bf16.mxu1 (!%p1106_p7), %v1475_v59  ;;  %v1487_v5 = vpack.c.bf16 (!%p1106_p7), %v896_v4, %v895_v3  ;;  %v898_v17 = vld [vmem:[%s1928_s16 + $0x48] sm:$0xff] (!%p1106_p7)  ;;  %v899_v8 = vld [vmem:[%s1928_s16 + $0x50] sm:$0xff] (!%p1106_p7)  ;;  %v900_v10 = vld [vmem:[%s1928_s16 + $0x58] sm:$0xff] (!%p1106_p7) }
 0x2c9   : > { %1478 = vmatpush3.bf16.msra.mxu0 (!%p1106_p7), %v1475_v59  ;;  %1519 = vmatpush3.bf16.msra.mxu1 (!%p1106_p7), %v1475_v59  ;;  %v1491_v7 = vpack.c.bf16 (!%p1106_p7), %v898_v17, %v897_v6  ;;  %v1495_v11 = vpack.c.bf16 (!%p1106_p7), %v900_v10, %v899_v8  ;;  %v901_v12 = vld [vmem:[%s1928_s16 + $0x60] sm:$0xff] (!%p1106_p7)  ;;  %v902_v13 = vld [vmem:[%s1928_s16 + $0x68] sm:$0xff] (!%p1106_p7)  ;;  %v903_v19 = vld [vmem:[%s1928_s16 + $0x70] sm:$0xff] (!%p1106_p7) }
 0x2ca   : > { %1480 = vmatprep.subr.bf16.mxu0 (!%p1106_p7), %v1479_v61  ;;  %1512 = vmatprep.subr.bf16.mxu1 (!%p1106_p7), %v1479_v61  ;;  %v1499_v14 = vpack.c.bf16 (!%p1106_p7), %v902_v13, %v901_v12  ;;  %v904_v58 = vld [vmem:[%s1928_s16 + $0x78] sm:$0xff] (!%p1106_p7) }
 0x2cb   : > { %v1503_v15 = vpack.c.bf16 %v904_v58, %v903_v19 }
 0x2cd   : > { %1482 = vmatpush3.bf16.msra.mxu0 %v1479_v61  ;;  %1520 = vmatpush3.bf16.msra.mxu1 %v1479_v61 }
 0x2ce   : > { %1484 = vmatprep.subr.bf16.mxu0 %v1483_v1  ;;  %1513 = vmatprep.subr.bf16.mxu1 %v1483_v1 }
 0x2d1   : > { %1486 = vmatpush3.bf16.msra.mxu0 %v1483_v1  ;;  %1521 = vmatpush3.bf16.msra.mxu1 %v1483_v1 }
 0x2d2   : > { %1488 = vmatprep.subr.bf16.mxu0 %v1487_v5  ;;  %1514 = vmatprep.subr.bf16.mxu1 %v1487_v5 }
 0x2d5   : > { %1490 = vmatpush3.bf16.msra.mxu0 %v1487_v5  ;;  %1522 = vmatpush3.bf16.msra.mxu1 %v1487_v5 }
 0x2d6   : > { %1492 = vmatprep.subr.bf16.mxu0 %v1491_v7  ;;  %1515 = vmatprep.subr.bf16.mxu1 %v1491_v7 }
 0x2d9   : > { %1494 = vmatpush3.bf16.msra.mxu0 %v1491_v7  ;;  %1523 = vmatpush3.bf16.msra.mxu1 %v1491_v7 }
 0x2da   : > { %1496 = vmatprep.subr.bf16.mxu0 %v1495_v11  ;;  %1516 = vmatprep.subr.bf16.mxu1 %v1495_v11 }
 0x2dd   : > { %1498 = vmatpush3.bf16.msra.mxu0 %v1495_v11  ;;  %1524 = vmatpush3.bf16.msra.mxu1 %v1495_v11 }
 0x2de   : > { %1500 = vmatprep.subr.bf16.mxu0 %v1499_v14  ;;  %1517 = vmatprep.subr.bf16.mxu1 %v1499_v14 }
 0x2e1   : > { %1502 = vmatpush3.bf16.msra.mxu0 %v1499_v14  ;;  %1525 = vmatpush3.bf16.msra.mxu1 %v1499_v14 }
 0x2e2   : > { %1504 = vmatprep.subr.bf16.mxu0 %v1503_v15  ;;  %1518 = vmatprep.subr.bf16.mxu1 %v1503_v15 }
 0x2e5   : > { %1506 = vmatpush3.bf16.msra.mxu0 %v1503_v15  ;;  %1526 = vmatpush3.bf16.msra.mxu1 %v1503_v15 }
 0x2e8   : > { %1342 = vmatmul.mubr.f32.vlgmr.msra.gmra.mrb[0].mxu0 %v884_v16  ;;  %1345 = vmatmul.mubr.f32.vlgmr.msra.gmra.mrb[0].mxu1 %v886_v62 }
 0x3b7   : > { %1001 = sbr.rel (%p1109_p8) target bundleno = 963 (0x3c3), region = 60 }
 0x3bb   : > { %v1343_v18 = vpop.f32.mrb[0].mxu0  ;;  %v1346_v20 = vpop.f32.mrb[0].mxu1 }
 0x3bc   : > { %v985_v21 = vadd.f32 %v1343_v18, %v1108_v2  ;;  %v995_v22 = vadd.f32 %v1346_v20, %v1108_v2  ;;  %v979_v23 = vpop.f32.mrb[1].mxu0  ;;  %v989_v24 = vpop.f32.mrb[1].mxu1 }
 0x3bd   : > { %v980_v9 = vadd.f32 %v1108_v2, %v979_v23  ;;  %v990_v25 = vadd.f32 %v1108_v2, %v989_v24 }
 0x3be   : > { %vm1003_vm5 = vcmp.ge.f32.partialorder %v985_v21, 0.0  ;;  %v1007_v27 = vmul.f32 0.01, %v985_v21  ;;  %vm1005_vm7 = vcmp.ge.f32.partialorder %v995_v22, 0.0  ;;  %v1009_v31 = vmul.f32 0.01, %v995_v22 }
 0x3bf   : > { %vm1002_vm4 = vcmp.ge.f32.partialorder %v980_v9, 0.0  ;;  %v1006_v26 = vmul.f32 0.01, %v980_v9  ;;  %vm1004_vm6 = vcmp.ge.f32.partialorder %v990_v25, 0.0  ;;  %v1008_v30 = vmul.f32 0.01, %v990_v25 }
 0x3c0   : > { %v1011_v33 = vsel %vm1003_vm5, %v985_v21, %v1007_v27  ;;  %v1013_v35 = vsel %vm1005_vm7, %v995_v22, %v1009_v31 }
 0x3c1   : > { %v1010_v32 = vsel %vm1002_vm4, %v980_v9, %v1006_v26  ;;  %1015 = vst [vmem:[#allocation2 + $0x8] sm:$0xff] %v1011_v33  ;;  %v1012_v34 = vsel %vm1004_vm6, %v990_v25, %v1008_v30  ;;  %1017 = vst [vmem:[#allocation2 + $0x18] sm:$0xff] %v1013_v35 }
 0x3c2   : > { %1014 = vst [vmem:[#allocation2] sm:$0xff] %v1010_v32  ;;  %1016 = vst [vmem:[#allocation2 + $0x10] sm:$0xff] %v1012_v34 }
 0x3c3 PF: > { %p1110_p9 = scmp.ne.s32.totalorder %s1598_s18, 1 }
 0x3c4   : > { %1022 = vst [vmem:[%s1978_s5] sm:$0xff] (!%p1110_p9), %v980_v9  ;;  %1023 = vst [vmem:[%s1978_s5 + $0x8] sm:$0xff] (!%p1110_p9), %v985_v21 }
 0x3c5   : > { %1021 = sbr.rel (%p1110_p9) target bundleno = 972 (0x3cc), region = 64  ;;  %1024 = vst [vmem:[%s1978_s5 + $0x10] sm:$0xff] (!%p1110_p9), %v990_v25  ;;  %1025 = vst [vmem:[%s1978_s5 + $0x18] sm:$0xff] (!%p1110_p9), %v995_v22 }
 0x3cc PF: > { %s15_s20 = sadd.s32 1, %s1606_s20   ;;  %s1979_s18 = smov %s1602_s19 }
 0x3cd   : > { %p12_p10 = scmp.ge.s32.totalorder %s15_s20, 4   ;;  %s1980_s19 = smov %s1982_s21 }
 0x3cf   :  { %14 = sbr.rel (!%p12_p10) target bundleno = 2 (0x2), region = 98 }

</bundles_post_ra>
